<compile_context>
chip_gen: v7x
topology: tpu7x:2x2x1
jax: 0.10.0
libtpu: 0.0.40
codegen_flags: <defaults>
</compile_context>

<pallas_src>
import functools

import jax
import jax.numpy as jnp
from jax.experimental import pallas as pl
from jax.experimental.pallas import tpu as pltpu


def _dual_residual_kernel(x_ref, y_ref, r1_ref, r2_ref, *, const):
    # const is a Python float -> compile-time VPU immediate splat.
    x = x_ref[...]
    cy = y_ref[...] * const
    r1_ref[...] = x + cy
    r2_ref[...] = x - cy


def _round_up(v, m):
    return -(-v // m) * m


def _vmem_budget_bytes():
    """Returns (buffer_budget_bytes, scoped_vmem_limit_bytes), generation-aware."""
    try:
        cap = pltpu.get_tpu_info().vmem_capacity_bytes
    except Exception:
        cap = 64 * 1024 * 1024  # conservative fallback: assume v7x-sized VMEM
    if cap >= 96 * 1024 * 1024:                      # v5e / v6e (128 MiB physical)
        return 64 * 1024 * 1024, 96 * 1024 * 1024
    return 32 * 1024 * 1024, 48 * 1024 * 1024        # v7x (64 MiB physical)


def _choose_tiles(rows, N, itemsize, sublane, target_block_bytes):
    """Pick (tile_m, tile_n) so 4 streams x 2 buffers fit the VMEM budget."""
    rows_ceil = _round_up(max(rows, 1), sublane)
    # Keep >= 2 row-grid steps when there is enough work to split, so the
    # 'parallel' grid axis can shard across v7x's 2 TensorCores.
    if rows_ceil >= 2 * sublane:
        row_cap = _round_up(-(-rows // 2), sublane)
    else:
        row_cap = rows_ceil

    bytes_per_full_row = N * itemsize
    if sublane * bytes_per_full_row <= target_block_bytes:
        # Full-N, lane-dense blocks; maximize rows within the budget.
        tile_n = N
        tile_m = (target_block_bytes // bytes_per_full_row) // sublane * sublane
        tile_m = max(sublane, min(tile_m, row_cap))
    else:
        # Extremely wide rows: also tile the lane axis (multiple of 128) so
        # the per-block DMA stays in the multi-MiB sweet spot without OOMing.
        tile_n = 2048
        tile_m = (target_block_bytes // (tile_n * itemsize)) // sublane * sublane
        tile_m = max(sublane, min(tile_m, row_cap))
    return tile_m, tile_n


def dual_residual(x, y, const=0.5):
    """Returns (r1, r2) = (x + const*y, x - const*y) in a single fused pass."""
    assert x.shape == y.shape and x.dtype == y.dtype
    orig_shape = x.shape
    N = orig_shape[-1]
    rows = 1
    for d in orig_shape[:-1]:
        rows *= d

    itemsize = jnp.dtype(x.dtype).itemsize
    # Sublane granularity: 8 rows for 32-bit, 16 for bf16, 32 for int8.
    sublane = 8 * max(1, 4 // itemsize)

    budget, vmem_limit = _vmem_budget_bytes()
    # 4 HBM streams (2 inputs + 2 outputs) x 2 pipeline buffers each.
    tile_m, tile_n = _choose_tiles(rows, N, itemsize, sublane, budget // 8)

    x2 = x.reshape(rows, N)
    y2 = y.reshape(rows, N)

    grid_m = pl.cdiv(rows, tile_m)
    grid_n = pl.cdiv(N, tile_n)
    block = (tile_m, tile_n)

    if grid_n == 1:
        grid = (grid_m,)
        idx = lambda i: (i, 0)
        semantics = ("parallel",)
    else:
        grid = (grid_m, grid_n)
        idx = lambda i, j: (i, j)
        semantics = ("parallel", "parallel")

    kernel = functools.partial(_dual_residual_kernel, const=float(const))

    cost = pl.CostEstimate(
        flops=3 * rows * N,                       # mul + add + sub per element
        transcendentals=0,
        bytes_accessed=4 * rows * N * itemsize,   # 2 reads + 2 writes
    )

    r1, r2 = pl.pallas_call(
        kernel,
        out_shape=(
            jax.ShapeDtypeStruct((rows, N), x.dtype),
            jax.ShapeDtypeStruct((rows, N), x.dtype),
        ),
        grid_spec=pltpu.PrefetchScalarGridSpec(
            num_scalar_prefetch=0,
            grid=grid,
            in_specs=[pl.BlockSpec(block, idx), pl.BlockSpec(block, idx)],
            out_specs=[pl.BlockSpec(block, idx), pl.BlockSpec(block, idx)],
        ),
        compiler_params=pltpu.CompilerParams(
            dimension_semantics=semantics,
            vmem_limit_bytes=vmem_limit,
        ),
        cost_estimate=cost,
    )(x2, y2)

    return r1.reshape(orig_shape), r2.reshape(orig_shape)


class Model:
    """JAX mirror of the PyTorch Model (const = 0.5)."""

    def __init__(self):
        self.const = 0.5

    def __call__(self, x, y):
        return dual_residual(x, y, self.const)


if __name__ == "__main__":
    # Small shapes consistent with the module's (1, 2048, 2048) inputs.
    B, M, N = 1, 256, 256
    key = jax.random.PRNGKey(0)
    kx, ky = jax.random.split(key)
    x = jax.random.normal(kx, (B, M, N), dtype=jnp.float32)
    y = jax.random.normal(ky, (B, M, N), dtype=jnp.float32)

    model = Model()
    r1, r2 = model(x, y)
    jax.block_until_ready((r1, r2))

    # Correctness check against plain-JAX reference.
    ref1 = x + model.const * y
    ref2 = x - model.const * y
    assert jnp.allclose(r1, ref1, atol=1e-6), "r1 mismatch"
    assert jnp.allclose(r2, ref2, atol=1e-6), "r2 mismatch"

    print("KERNEL_OK")
</pallas_src>

<mosaic_0001>
module attributes {stable_mosaic.version = 11 : i64} {
  func.func @_dual_residual_kernel(%arg0: i32, %arg1: memref<128x256xf32, #tpu.memory_space<vmem>>, %arg2: memref<128x256xf32, #tpu.memory_space<vmem>>, %arg3: memref<128x256xf32, #tpu.memory_space<vmem>>, %arg4: memref<128x256xf32, #tpu.memory_space<vmem>>) attributes {dimension_semantics = [#tpu.dimension_semantics<parallel>], iteration_bounds = array<i64: 2>, scalar_prefetch = 0 : i64, scratch_operands = 0 : i64, tpu.core_type = #tpu.core_type<tc>, window_params = [{transform_indices = @transform_0, window_bounds = array<i64: 128, 256>}, {transform_indices = @transform_1, window_bounds = array<i64: 128, 256>}, {transform_indices = @transform_2, window_bounds = array<i64: 128, 256>}, {transform_indices = @transform_3, window_bounds = array<i64: 128, 256>}]} {
    %c0 = arith.constant 0 : index
    %c0_0 = arith.constant 0 : index
    %0 = vector.load %arg1[%c0, %c0_0] : memref<128x256xf32, #tpu.memory_space<vmem>>, vector<128x256xf32>
    %c0_1 = arith.constant 0 : index
    %c0_2 = arith.constant 0 : index
    %1 = vector.load %arg2[%c0_1, %c0_2] : memref<128x256xf32, #tpu.memory_space<vmem>>, vector<128x256xf32>
    %cst = arith.constant 5.000000e-01 : f32
    %2 = vector.broadcast %cst : f32 to vector<128x256xf32>
    %3 = arith.mulf %1, %2 : vector<128x256xf32>
    %4 = arith.addf %0, %3 : vector<128x256xf32>
    %c0_3 = arith.constant 0 : index
    %c0_4 = arith.constant 0 : index
    %5 = vector.load %arg3[%c0_3, %c0_4] : memref<128x256xf32, #tpu.memory_space<vmem>>, vector<128x256xf32>
    tpu.vector_store %arg3[%c0_3, %c0_4], %4 {strides = array<i32>} : memref<128x256xf32, #tpu.memory_space<vmem>>, vector<128x256xf32>,
    %6 = arith.subf %0, %3 : vector<128x256xf32>
    %c0_5 = arith.constant 0 : index
    %c0_6 = arith.constant 0 : index
    %7 = vector.load %arg4[%c0_5, %c0_6] : memref<128x256xf32, #tpu.memory_space<vmem>>, vector<128x256xf32>
    tpu.vector_store %arg4[%c0_5, %c0_6], %6 {strides = array<i32>} : memref<128x256xf32, #tpu.memory_space<vmem>>, vector<128x256xf32>,
    return
  }
  func.func @transform_0(%arg0: i32) -> (i32, i32) {
    %c0_i32 = arith.constant 0 : i32
    %c0_i32_0 = arith.constant 0 : i32
    return %arg0, %c0_i32 : i32, i32
  }
  func.func @transform_1(%arg0: i32) -> (i32, i32) {
    %c0_i32 = arith.constant 0 : i32
    %c0_i32_0 = arith.constant 0 : i32
    return %arg0, %c0_i32 : i32, i32
  }
  func.func @transform_2(%arg0: i32) -> (i32, i32) {
    %c0_i32 = arith.constant 0 : i32
    %c0_i32_0 = arith.constant 0 : i32
    return %arg0, %c0_i32 : i32, i32
  }
  func.func @transform_3(%arg0: i32) -> (i32, i32) {
    %c0_i32 = arith.constant 0 : i32
    %c0_i32_0 = arith.constant 0 : i32
    return %arg0, %c0_i32 : i32, i32
  }
}

</mosaic_0001>

<bundles_post_ra>
// kernel: tpu_custom_call.1
= control target key start
LH: loop header
LB: loop body
LE: loop exit
PB: predicated region body
PF: predicated region fallthrough
CT: control target
= control target key end

     0   :  { %9 = vsyncpa [#allocation3], 0  ;;  %s1533_s0 = inlined_call_operand.hbm [shape: f32[256,256], index: 0, kind: input, shape index: {}]   ;;  %s1534_s1 = inlined_call_operand.hbm [shape: f32[256,256], index: 1, kind: input, shape index: {}]   ;;  %s1535_s2 = inlined_call_operand.hbm [shape: f32[256,256], index: 2, kind: output, shape index: {0}]   ;;  %s1536_s3 = inlined_call_operand.hbm [shape: f32[256,256], index: 3, kind: output, shape index: {1}]  }
   0x1   :  { %11 = vsyncpa [#allocation3 + $0x1], 0 }
   0x2   :  { %12 = vsyncpa [#allocation6], 0 }
   0x3   :  { %14 = vsyncpa [#allocation6 + $0x1], 0 }
   0x4   :  { %15 = vsyncpa [#allocation4], 0 }
   0x5   :  { %17 = vsyncpa [#allocation4 + $0x1], 0 }
   0x6   :  { %18 = vsyncpa [#allocation9], 0 }
   0x7   :  { %20 = vsyncpa [#allocation9 + $0x1], 0  ;;  %s921_s12 = smov 0   ;;  %s923_s13 = smov 0  }
   0x8   :  { %s925_s14 = smov 0   ;;  %s927_s15 = smov 0  }
   0x9 LB: > { %s942_s16 = sadd.s32 4294967295, %s891_s15   ;;  %s635_s17 = sadd.s32 4294967294, %s891_s15   ;;  %s891_s15 = sphi %s927_s15, %s1552_s15   ;;  %s887_s14 = sphi %s925_s14, %s1551_s14   ;;  %s883_s13 = sphi %s923_s13, %s1550_s13   ;;  %s879_s12 = sphi %s921_s12, %s1549_s12  }
   0xa   : > { %s946_s18 = sadd.s32 1, %s891_s15   ;;  %s33_s19 = sadd.s32 1, %s887_s14 }
   0xb   : > { %s30_s20 = ssub.s32 %s891_s15, %s946_s18  ;;  %p40_p0 = scmp.ne.s32.totalorder %s887_s14, %s883_s13 }
   0xc   : > { %p31_p1 = scmp.eq.s32.totalorder %s30_s20, 0  ;;  %p41_p2 = scmp.eq.s32.totalorder %s891_s15, 0 }
   0xd   : > { %p46_p3 = scmp.ne.s32.totalorder %s883_s13, %s879_s12  ;;  %p47_p4 = scmp.eq.s32.totalorder %s942_s16, 0 }
   0xe   : > { %s958_s21 = scalar_select %p31_p1, %s887_s14, %s33_s19  }
   0xf   : > { %p960_p5 = por %p41_p2, %p40_p0  ;;  %p964_p6 = por %p47_p4, %p46_p3 }
  0x10   : > { %p96_p7 = scmp.eq.s32.totalorder %s942_s16, 1  ;;  %p102_p8 = scmp.eq.s32.totalorder %s635_s17, 1 }
  0x11   : > { %s1540_s23 = scalar_select %p964_p6, 1, 0 }
  0x12   : > { %p691_p10 = scmp.lt.s32.totalorder %s891_s15, 2  ;;  %p971_p11 = por %p96_p7, %p40_p0 }
  0x13   : > { %p975_p12 = por %p102_p8, %p46_p3  ;;  %s980_s26 = sand.u32 1, %s887_s14  }
  0x14   : > { %s1541_s24 = scalar_select %p971_p11, 1, 0 }
  0x15   : > { %s1542_s25 = scalar_select %p975_p12, 1, 0 }
  0x16   : > { %s662_s27 = sshll.u32 %s891_s15, 12  ;;  %s638_s28 = sshll.u32 %s980_s26, 8 }
  0x17   : > { %s989_s4 = scalar_lea.hbm %s1533_s0, %s662_s27  ;;  %s152_s5 = scalar_lea.vmem [#allocation2], %s638_s28 }
  0x18   : > { %s160_s6 = sshll.u32 %s152_s5, 4  ;;  %p995_p13 = pnand %p691_p10, %p960_p5  ;;  %s999_s6 = int_to_ptr.vmem [resolvable:$true] %s160_s6 }
  0x19   : > { %s149_s8 = scalar_lea.sflag [#allocation3], %s980_s26  ;;  %s729_s9 = scalar_lea.hbm %s989_s4, 4096 }
  0x1a   : > { %p730_p0 = scmp.ne.s32.totalorder %s989_s4, %s729_s9  ;;  %p731_p1 = pneg %p995_p13 }
  0x1b   : > { %s734_s17 = scalar_lea.hbm %s1533_s0, 8192  ;;  %p735_p4 = scmp.lt.u32.totalorder %s989_s4, %s1533_s0 }
  0x1c   : > { %p732_p2 = pnand %p731_p1, %p730_p0  ;;  %p736_p5 = scmp.lt.u32.totalorder %s734_s17, %s729_s9 }
  0x1d   : > { %p738_p8 = scmp.lt.u32.totalorder %s729_s9, %s989_s4 }
  0x1e   : > { %p733_p3 = pneg %p732_p2  ;;  %p737_p7 = por %p736_p5, %p735_p4 }
  0x20   : > { %p739_p10 = por %p738_p8, %p737_p7 }
  0x22   : > { %p740_p9 = pnand %p739_p10, %p733_p3 }
  0x24   : > { %743 = shalt.err (!%p740_p9)
}
  0x25   : > { %s744_s22 = scalar_lea.vmem %s999_s6, 4096  ;;  %s893_s29 = smov [#allocation2]  }
  0x26   : > { %p745_p0 = scmp.ne.s32.totalorder %s999_s6, %s744_s22  ;;  %s749_s30 = sshll.u32 %s893_s29, 4  ;;  %s750_s30 = int_to_ptr.vmem [resolvable:$false] %s749_s30 }
  0x27   : > { %s751_s5 = scalar_lea.vmem %s750_s30, 8192  ;;  %p752_p11 = scmp.lt.s32.totalorder %s999_s6, %s750_s30 }
  0x28   : > { %p747_p2 = pnand %p745_p0, %p731_p1  ;;  %p753_p4 = scmp.lt.s32.totalorder %s751_s5, %s744_s22 }
  0x2a   : > { %p748_p12 = pneg %p747_p2  ;;  %p754_p5 = por %p753_p4, %p752_p11 }
  0x2c   : > { %p755_p7 = pnand %p754_p5, %p748_p12 }
  0x2e   : > { %758 = shalt.err (!%p755_p7)
}
  0x2f   : > { %s894_s9 = smov 256   ;;  %s895_s10 = smov 16  }
  0x30   : > { %680 = dma.hbm_to_vmem [thread:$0]  (!%p995_p13), %s989_s4, 4096, %s999_s6, %s149_s8, %s894_s9, %s894_s9, %s895_s10  }
  0x31   : > { %p646_p9 = scmp.ge.s32.totalorder %s891_s15, 1  ;;  %p190_p11 = scmp.lt.s32.totalorder %s891_s15, 3 }
  0x32   : > { %s1043_s20 = scalar_lea.hbm %s1534_s1, %s662_s27  ;;  %s174_s22 = scalar_lea.vmem [#allocation5], %s638_s28 }
  0x33   : > { %p1034_p12 = pnand %p646_p9, %p190_p11  ;;  %s182_s29 = sshll.u32 %s174_s22, 4  ;;  %s1047_s29 = int_to_ptr.vmem [resolvable:$true] %s182_s29 }
  0x34   : > { %s171_s4 = scalar_lea.sflag [#allocation6], %s980_s26  ;;  %s759_s6 = scalar_lea.hbm %s1043_s20, 4096 }
  0x35   : > { %p760_p3 = scmp.ne.s32.totalorder %s1043_s20, %s759_s6  ;;  %s764_s27 = scalar_lea.hbm %s1534_s1, 8192 }
  0x36   : > { %p765_p0 = scmp.lt.u32.totalorder %s1043_s20, %s1534_s1  ;;  %p766_p2 = scmp.lt.u32.totalorder %s764_s27, %s759_s6 }
  0x37   : > { %p762_p8 = pnand %p760_p3, %p731_p1  ;;  %p768_p5 = scmp.lt.u32.totalorder %s759_s6, %s1043_s20 }
  0x38   : > { %p767_p4 = por %p766_p2, %p765_p0 }
  0x39   : > { %p763_p10 = pneg %p762_p8 }
  0x3a   : > { %p769_p7 = por %p768_p5, %p767_p4 }
  0x3c   : > { %p770_p9 = pnand %p769_p7, %p763_p10 }
  0x3e   : > { %773 = shalt.err (!%p770_p9)
}
  0x3f   : > { %s774_s28 = scalar_lea.vmem %s1047_s29, 4096  ;;  %s896_s19 = smov [#allocation5]  }
  0x40   : > { %p775_p11 = scmp.ne.s32.totalorder %s1047_s29, %s774_s28  ;;  %s779_s22 = sshll.u32 %s896_s19, 4  ;;  %s780_s22 = int_to_ptr.vmem [resolvable:$false] %s779_s22 }
  0x41   : > { %s781_s8 = scalar_lea.vmem %s780_s22, 8192  ;;  %p782_p6 = scmp.lt.s32.totalorder %s1047_s29, %s780_s22 }
  0x42   : > { %p777_p3 = pnand %p775_p11, %p731_p1  ;;  %p783_p0 = scmp.lt.s32.totalorder %s781_s8, %s774_s28 }
  0x44   : > { %p778_p8 = pneg %p777_p3  ;;  %p784_p2 = por %p783_p0, %p782_p6 }
  0x46   : > { %p785_p4 = pnand %p784_p2, %p778_p8 }
  0x48   : > { %788 = shalt.err (!%p785_p4)
}
  0x49   : > { %683 = dma.hbm_to_vmem [thread:$0]  (!%p995_p13), %s1043_s20, 4096, %s1047_s29, %s171_s4, %s894_s9, %s894_s9, %s895_s10  }
  0x4a   : > { %194 = sbr.rel (%p1034_p12) target bundleno = 160 (0xa0), region = 28  ;;  %s1081_s6 = sand.u32 (!%p1034_p12), 1, %s883_s13  }
  0x4b   : > { %s1084_s30 = sshll.u32 (!%p1034_p12), %s1081_s6, 8  ;;  %s197_s7 = scalar_lea.sflag (!%p1034_p12), [#allocation3], %s1081_s6 }
  0x4c   : > { %s1088_s27 = scalar_lea.vmem (!%p1034_p12), [#allocation2], %s1084_s30  ;;  %p1545_p6 = scmp.ne.s32.totalorder (!%p1034_p12), %s1540_s23, 0 }
  0x51   : > { %862 = dma.done.wait (%p1545_p6), %s197_s7, 4096  }
  0x52   : > { %864 = vsyncadd (%p1545_p6), %s197_s7, 4294963200  ;;  %s206_s26 = scalar_lea.sflag [#allocation6], %s1081_s6  ;;  %s1096_s9 = scalar_lea.vmem [#allocation5], %s1084_s30 }
  0x53   : > { %866 = dma.done.wait (%p1545_p6), %s206_s26, 4096  }
  0x54   : > { %868 = vsyncadd (%p1545_p6), %s206_s26, 4294963200  ;;  %v246_v0 = vld [vmem:[%s1088_s27] sm:$0xff]  ;;  %v247_v2 = vld [vmem:[%s1088_s27 + $0x8] sm:$0xff]  ;;  %s1126_s23 = scalar_lea.vmem [#allocation7], %s1084_s30  ;;  %s1135_s10 = scalar_lea.vmem [#allocation8], %s1084_s30 }
  0x55   : > { %v278_v1 = vld [vmem:[%s1096_s9] sm:$0xff]  ;;  %v279_v4 = vld [vmem:[%s1096_s9 + $0x8] sm:$0xff]  ;;  %v248_v5 = vld [vmem:[%s1088_s27 + $0x10] sm:$0xff]  ;;  %s666_s11 = sshll.u32 %s942_s16, 12  ;;  %s490_s20 = sshll.u32 %s1126_s23, 4  ;;  %s1414_s20 = int_to_ptr.vmem [resolvable:$true] %s490_s20 }
  0x56   : > { %v310_v3 = vmul.f32 0.5, %v278_v1  ;;  %v280_v6 = vld [vmem:[%s1096_s9 + $0x10] sm:$0xff]  ;;  %v311_v7 = vmul.f32 0.5, %v279_v4  ;;  %v249_v9 = vld [vmem:[%s1088_s27 + $0x18] sm:$0xff]  ;;  %v250_v11 = vld [vmem:[%s1088_s27 + $0x20] sm:$0xff]  ;;  %s1401_s5 = scalar_lea.hbm %s1535_s2, %s666_s11  ;;  %s507_s17 = sshll.u32 %s1135_s10, 4  ;;  %s1453_s17 = int_to_ptr.vmem [resolvable:$true] %s507_s17 }
  0x57   : > { %v312_v8 = vmul.f32 0.5, %v280_v6  ;;  %v281_v10 = vld [vmem:[%s1096_s9 + $0x18] sm:$0xff]  ;;  %v282_v14 = vld [vmem:[%s1096_s9 + $0x20] sm:$0xff]  ;;  %v1113_v15 = vld [vmem:[%s1088_s27 + $0x28] sm:$0xff]  ;;  %s1451_s22 = scalar_lea.hbm %s1536_s3, %s666_s11  ;;  %s471_s8 = scalar_lea.sflag [#allocation4], %s1081_s6 }
  0x58   : > { %v342_v12 = vadd.f32 %v310_v3, %v246_v0  ;;  %v313_v13 = vmul.f32 0.5, %v281_v10  ;;  %v283_v16 = vld [vmem:[%s1096_s9 + $0x28] sm:$0xff]  ;;  %v406_v17 = vsub.f32 %v246_v0, %v310_v3  ;;  %v343_v18 = vadd.f32 %v311_v7, %v247_v2  ;;  %v1119_v22 = vld [vmem:[%s1088_s27 + $0x30] sm:$0xff]  ;;  %v1123_v24 = vld [vmem:[%s1088_s27 + $0x38] sm:$0xff]  ;;  %s789_s30 = scalar_lea.vmem %s1414_s20, 4096  ;;  %p1546_p1 = scmp.ne.s32.totalorder %s1541_s24, 0 }
  0x59   : > { %v344_v19 = vadd.f32 %v312_v8, %v248_v5  ;;  %v314_v20 = vmul.f32 0.5, %v282_v14  ;;  %v1116_v21 = vmul.f32 0.5, %v283_v16  ;;  %v284_v23 = vld [vmem:[%s1096_s9 + $0x30] sm:$0xff]  ;;  %v285_v27 = vld [vmem:[%s1096_s9 + $0x38] sm:$0xff]  ;;  %v1131_v28 = vld [vmem:[%s1088_s27 + $0x40] sm:$0xff]  ;;  %v407_v30 = vsub.f32 %v247_v2, %v311_v7  ;;  %p790_p13 = scmp.ne.s32.totalorder %s1414_s20, %s789_s30  ;;  %s897_s7 = smov [#allocation7]  }
  0x5a   : > { %374 = vst [vmem:[%s1126_s23] sm:$0xff] %v342_v12  ;;  %v345_v25 = vadd.f32 %v313_v13, %v249_v9  ;;  %v316_v26 = vmul.f32 0.5, %v284_v23  ;;  %v286_v29 = vld [vmem:[%s1096_s9 + $0x40] sm:$0xff]  ;;  %438 = vst [vmem:[%s1135_s10] sm:$0xff] %v406_v17  ;;  %v408_v31 = vsub.f32 %v248_v5, %v312_v8  ;;  %v1142_v34 = vmul.f32 0.5, %v285_v27  ;;  %v1147_v36 = vld [vmem:[%s1088_s27 + $0x48] sm:$0xff]  ;;  %s793_s16 = sshll.u32 %s897_s7, 4  ;;  %s794_s16 = int_to_ptr.vmem [resolvable:$false] %s793_s16 }
  0x5b   : > { %375 = vst [vmem:[%s1126_s23 + $0x8] sm:$0xff] %v343_v18  ;;  %376 = vst [vmem:[%s1126_s23 + $0x10] sm:$0xff] %v344_v19  ;;  %v346_v32 = vadd.f32 %v314_v20, %v250_v11  ;;  %v347_v33 = vadd.f32 %v1116_v21, %v1113_v15  ;;  %v1144_v35 = vmul.f32 0.5, %v286_v29  ;;  %v287_v37 = vld [vmem:[%s1096_s9 + $0x48] sm:$0xff]  ;;  %v1151_v38 = vld [vmem:[%s1088_s27 + $0x50] sm:$0xff]  ;;  %v409_v44 = vsub.f32 %v249_v9, %v313_v13  ;;  %p791_p12 = pnand %p790_p13, %p1546_p1  ;;  %p796_p5 = scmp.lt.s32.totalorder %s1414_s20, %s794_s16 }
  0x5c   : > { %377 = vst [vmem:[%s1126_s23 + $0x18] sm:$0xff] %v345_v25  ;;  %v348_v39 = vadd.f32 %v316_v26, %v1119_v22  ;;  %v1155_v40 = vmul.f32 0.5, %v287_v37  ;;  %v288_v41 = vld [vmem:[%s1096_s9 + $0x50] sm:$0xff]  ;;  %v1159_v42 = vld [vmem:[%s1088_s27 + $0x58] sm:$0xff]  ;;  %439 = vst [vmem:[%s1135_s10 + $0x8] sm:$0xff] %v407_v30  ;;  %v410_v45 = vsub.f32 %v250_v11, %v314_v20  ;;  %v349_v46 = vadd.f32 %v1142_v34, %v1123_v24 }
  0x5d   : > { %v289_v43 = vld [vmem:[%s1096_s9 + $0x58] sm:$0xff]  ;;  %440 = vst [vmem:[%s1135_s10 + $0x10] sm:$0xff] %v408_v31  ;;  %378 = vst [vmem:[%s1126_s23 + $0x20] sm:$0xff] %v346_v32  ;;  %v350_v47 = vadd.f32 %v1144_v35, %v1131_v28  ;;  %v1170_v48 = vmul.f32 0.5, %v288_v41  ;;  %v1175_v50 = vld [vmem:[%s1088_s27 + $0x60] sm:$0xff]  ;;  %v411_v58 = vsub.f32 %v1113_v15, %v1116_v21  ;;  %v412_v59 = vsub.f32 %v1119_v22, %v316_v26  ;;  %p792_p10 = pneg %p791_p12 }
  0x5e   : > { %379 = vst [vmem:[%s1126_s23 + $0x28] sm:$0xff] %v347_v33  ;;  %v1172_v49 = vmul.f32 0.5, %v289_v43  ;;  %v290_v51 = vld [vmem:[%s1096_s9 + $0x60] sm:$0xff]  ;;  %v1179_v52 = vld [vmem:[%s1088_s27 + $0x68] sm:$0xff]  ;;  %380 = vst [vmem:[%s1126_s23 + $0x30] sm:$0xff] %v348_v39  ;;  %v351_v53 = vadd.f32 %v1155_v40, %v1147_v36  ;;  %v413_v8 = vsub.f32 %v1123_v24, %v1142_v34  ;;  %v414_v9 = vsub.f32 %v1131_v28, %v1144_v35 }
  0x5f   : > { %v1184_v54 = vmul.f32 0.5, %v290_v51  ;;  %v291_v55 = vld [vmem:[%s1096_s9 + $0x68] sm:$0xff]  ;;  %v1188_v56 = vld [vmem:[%s1088_s27 + $0x70] sm:$0xff]  ;;  %441 = vst [vmem:[%s1135_s10 + $0x18] sm:$0xff] %v409_v44  ;;  %442 = vst [vmem:[%s1135_s10 + $0x20] sm:$0xff] %v410_v45  ;;  %v352_v60 = vadd.f32 %v1170_v48, %v1151_v38  ;;  %v415_v22 = vsub.f32 %v1147_v36, %v1155_v40  ;;  %v416_v23 = vsub.f32 %v1151_v38, %v1170_v48 }
  0x60   : > { %v292_v57 = vld [vmem:[%s1096_s9 + $0x70] sm:$0xff]  ;;  %381 = vst [vmem:[%s1126_s23 + $0x38] sm:$0xff] %v349_v46  ;;  %382 = vst [vmem:[%s1126_s23 + $0x40] sm:$0xff] %v350_v47  ;;  %v353_v61 = vadd.f32 %v1172_v49, %v1159_v42  ;;  %v1202_v62 = vmul.f32 0.5, %v291_v55  ;;  %v1207_v0 = vld [vmem:[%s1088_s27 + $0x78] sm:$0xff]  ;;  %v417_v36 = vsub.f32 %v1159_v42, %v1172_v49 }
  0x61   : > { %v1204_v63 = vmul.f32 0.5, %v292_v57  ;;  %v293_v1 = vld [vmem:[%s1096_s9 + $0x78] sm:$0xff]  ;;  %v1211_v2 = vld [vmem:[%s1088_s27 + $0x80] sm:$0xff]  ;;  %383 = vst [vmem:[%s1126_s23 + $0x48] sm:$0xff] %v351_v53  ;;  %v354_v3 = vadd.f32 %v1184_v54, %v1175_v50  ;;  %v1220_v6 = vld [vmem:[%s1088_s27 + $0x88] sm:$0xff]  ;;  %v418_v37 = vsub.f32 %v1175_v50, %v1184_v54 }
  0x62   : > { %v1216_v4 = vmul.f32 0.5, %v293_v1  ;;  %v294_v5 = vld [vmem:[%s1096_s9 + $0x80] sm:$0xff]  ;;  %v295_v7 = vld [vmem:[%s1096_s9 + $0x88] sm:$0xff]  ;;  %443 = vst [vmem:[%s1135_s10 + $0x28] sm:$0xff] %v411_v58  ;;  %444 = vst [vmem:[%s1135_s10 + $0x30] sm:$0xff] %v412_v59  ;;  %v355_v10 = vadd.f32 %v1202_v62, %v1179_v52  ;;  %v419_v50 = vsub.f32 %v1179_v52, %v1202_v62 }
  0x63   : > { %384 = vst [vmem:[%s1126_s23 + $0x50] sm:$0xff] %v352_v60  ;;  %385 = vst [vmem:[%s1126_s23 + $0x58] sm:$0xff] %v353_v61  ;;  %v356_v11 = vadd.f32 %v1204_v63, %v1188_v56  ;;  %v1235_v12 = vmul.f32 0.5, %v294_v5  ;;  %v1237_v13 = vmul.f32 0.5, %v295_v7  ;;  %v1240_v14 = vld [vmem:[%s1088_s27 + $0x90] sm:$0xff]  ;;  %v1244_v16 = vld [vmem:[%s1088_s27 + $0x98] sm:$0xff]  ;;  %v420_v51 = vsub.f32 %v1188_v56, %v1204_v63 }
  0x64   : > { %v296_v15 = vld [vmem:[%s1096_s9 + $0x90] sm:$0xff]  ;;  %386 = vst [vmem:[%s1126_s23 + $0x60] sm:$0xff] %v354_v3  ;;  %v357_v17 = vadd.f32 %v1216_v4, %v1207_v0  ;;  %v297_v19 = vld [vmem:[%s1096_s9 + $0x98] sm:$0xff]  ;;  %v1253_v20 = vld [vmem:[%s1088_s27 + $0xa0] sm:$0xff]  ;;  %v421_v1 = vsub.f32 %v1207_v0, %v1216_v4 }
  0x65   : > { %v1249_v18 = vmul.f32 0.5, %v296_v15  ;;  %v298_v21 = vld [vmem:[%s1096_s9 + $0xa0] sm:$0xff]  ;;  %445 = vst [vmem:[%s1135_s10 + $0x38] sm:$0xff] %v413_v8  ;;  %446 = vst [vmem:[%s1135_s10 + $0x40] sm:$0xff] %v414_v9  ;;  %v358_v24 = vadd.f32 %v1235_v12, %v1211_v2  ;;  %v359_v25 = vadd.f32 %v1237_v13, %v1220_v6  ;;  %v1268_v26 = vmul.f32 0.5, %v297_v19  ;;  %v1273_v28 = vld [vmem:[%s1088_s27 + $0xa8] sm:$0xff] }
  0x66   : > { %387 = vst [vmem:[%s1126_s23 + $0x68] sm:$0xff] %v355_v10  ;;  %388 = vst [vmem:[%s1126_s23 + $0x70] sm:$0xff] %v356_v11  ;;  %v1270_v27 = vmul.f32 0.5, %v298_v21  ;;  %v299_v29 = vld [vmem:[%s1096_s9 + $0xa8] sm:$0xff]  ;;  %v1277_v30 = vld [vmem:[%s1088_s27 + $0xb0] sm:$0xff]  ;;  %v422_v3 = vsub.f32 %v1211_v2, %v1235_v12  ;;  %v423_v15 = vsub.f32 %v1220_v6, %v1237_v13 }
  0x67   : > { %389 = vst [vmem:[%s1126_s23 + $0x78] sm:$0xff] %v357_v17  ;;  %v360_v31 = vadd.f32 %v1249_v18, %v1240_v14  ;;  %v1282_v32 = vmul.f32 0.5, %v299_v29  ;;  %v300_v33 = vld [vmem:[%s1096_s9 + $0xb0] sm:$0xff]  ;;  %v1286_v34 = vld [vmem:[%s1088_s27 + $0xb8] sm:$0xff]  ;;  %447 = vst [vmem:[%s1135_s10 + $0x48] sm:$0xff] %v415_v22  ;;  %v361_v38 = vadd.f32 %v1268_v26, %v1244_v16  ;;  %v424_v17 = vsub.f32 %v1240_v14, %v1249_v18 }
  0x68   : > { %v301_v35 = vld [vmem:[%s1096_s9 + $0xb8] sm:$0xff]  ;;  %448 = vst [vmem:[%s1135_s10 + $0x50] sm:$0xff] %v416_v23  ;;  %390 = vst [vmem:[%s1126_s23 + $0x80] sm:$0xff] %v358_v24  ;;  %v362_v39 = vadd.f32 %v1270_v27, %v1253_v20  ;;  %v1301_v40 = vmul.f32 0.5, %v300_v33  ;;  %v1306_v42 = vld [vmem:[%s1088_s27 + $0xc0] sm:$0xff]  ;;  %v425_v23 = vsub.f32 %v1244_v16, %v1268_v26  ;;  %v426_v13 = vsub.f32 %v1253_v20, %v1270_v27 }
  0x69   : > { %391 = vst [vmem:[%s1126_s23 + $0x88] sm:$0xff] %v359_v25  ;;  %v1303_v41 = vmul.f32 0.5, %v301_v35  ;;  %v302_v43 = vld [vmem:[%s1096_s9 + $0xc0] sm:$0xff]  ;;  %v1310_v44 = vld [vmem:[%s1088_s27 + $0xc8] sm:$0xff]  ;;  %392 = vst [vmem:[%s1126_s23 + $0x90] sm:$0xff] %v360_v31  ;;  %v363_v45 = vadd.f32 %v1282_v32, %v1273_v28  ;;  %v427_v14 = vsub.f32 %v1273_v28, %v1282_v32 }
  0x6a   : > { %v1315_v46 = vmul.f32 0.5, %v302_v43  ;;  %v303_v47 = vld [vmem:[%s1096_s9 + $0xc8] sm:$0xff]  ;;  %v1319_v48 = vld [vmem:[%s1088_s27 + $0xd0] sm:$0xff]  ;;  %449 = vst [vmem:[%s1135_s10 + $0x58] sm:$0xff] %v417_v36  ;;  %450 = vst [vmem:[%s1135_s10 + $0x60] sm:$0xff] %v418_v37  ;;  %v364_v53 = vadd.f32 %v1301_v40, %v1277_v30  ;;  %v428_v16 = vsub.f32 %v1277_v30, %v1301_v40 }
  0x6b   : > { %v304_v49 = vld [vmem:[%s1096_s9 + $0xd0] sm:$0xff]  ;;  %393 = vst [vmem:[%s1126_s23 + $0x98] sm:$0xff] %v361_v38  ;;  %394 = vst [vmem:[%s1126_s23 + $0xa0] sm:$0xff] %v362_v39  ;;  %v365_v54 = vadd.f32 %v1303_v41, %v1286_v34  ;;  %v1334_v55 = vmul.f32 0.5, %v303_v47  ;;  %v1339_v52 = vld [vmem:[%s1088_s27 + $0xd8] sm:$0xff]  ;;  %v429_v20 = vsub.f32 %v1286_v34, %v1303_v41 }
  0x6c   : > { %v1336_v57 = vmul.f32 0.5, %v304_v49  ;;  %v305_v56 = vld [vmem:[%s1096_s9 + $0xd8] sm:$0xff]  ;;  %v1343_v58 = vld [vmem:[%s1088_s27 + $0xe0] sm:$0xff]  ;;  %395 = vst [vmem:[%s1126_s23 + $0xa8] sm:$0xff] %v363_v45  ;;  %v366_v59 = vadd.f32 %v1315_v46, %v1306_v42  ;;  %v1352_v62 = vld [vmem:[%s1088_s27 + $0xe8] sm:$0xff]  ;;  %v430_v24 = vsub.f32 %v1306_v42, %v1315_v46 }
  0x6d   : > { %v1348_v60 = vmul.f32 0.5, %v305_v56  ;;  %v306_v61 = vld [vmem:[%s1096_s9 + $0xe0] sm:$0xff]  ;;  %v307_v63 = vld [vmem:[%s1096_s9 + $0xe8] sm:$0xff]  ;;  %451 = vst [vmem:[%s1135_s10 + $0x68] sm:$0xff] %v419_v50  ;;  %452 = vst [vmem:[%s1135_s10 + $0x70] sm:$0xff] %v420_v51  ;;  %v367_v5 = vadd.f32 %v1334_v55, %v1310_v44  ;;  %v431_v25 = vsub.f32 %v1310_v44, %v1334_v55 }
  0x6e   : > { %396 = vst [vmem:[%s1126_s23 + $0xb0] sm:$0xff] %v364_v53  ;;  %397 = vst [vmem:[%s1126_s23 + $0xb8] sm:$0xff] %v365_v54  ;;  %v368_v7 = vadd.f32 %v1336_v57, %v1319_v48  ;;  %v338_v8 = vmul.f32 0.5, %v306_v61  ;;  %v339_v9 = vmul.f32 0.5, %v307_v63  ;;  %v1369_v0 = vld [vmem:[%s1088_s27 + $0xf0] sm:$0xff]  ;;  %v1379_v11 = vld [vmem:[%s1088_s27 + $0xf8] sm:$0xff]  ;;  %v432_v26 = vsub.f32 %v1319_v48, %v1336_v57 }
  0x6f   : > { %v308_v4 = vld [vmem:[%s1096_s9 + $0xf0] sm:$0xff]  ;;  %398 = vst [vmem:[%s1126_s23 + $0xc0] sm:$0xff] %v366_v59  ;;  %v369_v2 = vadd.f32 %v1348_v60, %v1339_v52  ;;  %v309_v12 = vld [vmem:[%s1096_s9 + $0xf8] sm:$0xff]  ;;  %453 = vst [vmem:[%s1135_s10 + $0x78] sm:$0xff] %v421_v1  ;;  %v433_v27 = vsub.f32 %v1339_v52, %v1348_v60  ;;  %s795_s27 = scalar_lea.vmem %s794_s16, 8192 }
  0x70   : > { %v1376_v10 = vmul.f32 0.5, %v308_v4  ;;  %454 = vst [vmem:[%s1135_s10 + $0x80] sm:$0xff] %v422_v3  ;;  %399 = vst [vmem:[%s1126_s23 + $0xc8] sm:$0xff] %v367_v5  ;;  %v370_v19 = vadd.f32 %v338_v8, %v1343_v58  ;;  %v371_v21 = vadd.f32 %v339_v9, %v1352_v62  ;;  %v1392_v22 = vmul.f32 0.5, %v309_v12  ;;  %p797_p7 = scmp.lt.s32.totalorder %s795_s27, %s789_s30 }
  0x71   : > { %400 = vst [vmem:[%s1126_s23 + $0xd0] sm:$0xff] %v368_v7  ;;  %401 = vst [vmem:[%s1126_s23 + $0xd8] sm:$0xff] %v369_v2  ;;  %v434_v28 = vsub.f32 %v1343_v58, %v338_v8  ;;  %v435_v29 = vsub.f32 %v1352_v62, %v339_v9 }
  0x72   : > { %v372_v6 = vadd.f32 %v1376_v10, %v1369_v0  ;;  %455 = vst [vmem:[%s1135_s10 + $0x88] sm:$0xff] %v423_v15  ;;  %456 = vst [vmem:[%s1135_s10 + $0x90] sm:$0xff] %v424_v17  ;;  %v373_v18 = vadd.f32 %v1392_v22, %v1379_v11  ;;  %v436_v30 = vsub.f32 %v1369_v0, %v1376_v10  ;;  %p798_p9 = por %p797_p7, %p796_p5 }
  0x73   : > { %402 = vst [vmem:[%s1126_s23 + $0xe0] sm:$0xff] %v370_v19  ;;  %403 = vst [vmem:[%s1126_s23 + $0xe8] sm:$0xff] %v371_v21  ;;  %v437_v31 = vsub.f32 %v1379_v11, %v1392_v22 }
  0x74   : > { %457 = vst [vmem:[%s1135_s10 + $0x98] sm:$0xff] %v425_v23  ;;  %404 = vst [vmem:[%s1126_s23 + $0xf0] sm:$0xff] %v372_v6  ;;  %p799_p11 = pnand %p798_p9, %p792_p10 }
  0x75   : > { %458 = vst [vmem:[%s1135_s10 + $0xa0] sm:$0xff] %v426_v13  ;;  %459 = vst [vmem:[%s1135_s10 + $0xa8] sm:$0xff] %v427_v14 }
  0x76   : > { %460 = vst [vmem:[%s1135_s10 + $0xb0] sm:$0xff] %v428_v16  ;;  %405 = vst [vmem:[%s1126_s23 + $0xf8] sm:$0xff] %v373_v18 }
  0x77   : > { %461 = vst [vmem:[%s1135_s10 + $0xb8] sm:$0xff] %v429_v20  ;;  %462 = vst [vmem:[%s1135_s10 + $0xc0] sm:$0xff] %v430_v24 }
  0x78   : > { %463 = vst [vmem:[%s1135_s10 + $0xc8] sm:$0xff] %v431_v25  ;;  %464 = vst [vmem:[%s1135_s10 + $0xd0] sm:$0xff] %v432_v26 }
  0x79   : > { %465 = vst [vmem:[%s1135_s10 + $0xd8] sm:$0xff] %v433_v27  ;;  %466 = vst [vmem:[%s1135_s10 + $0xe0] sm:$0xff] %v434_v28 }
  0x7a   : > { %467 = vst [vmem:[%s1135_s10 + $0xe8] sm:$0xff] %v435_v29 }
  0x7b   : > { %802 = shalt.err (!%p799_p11)
}
  0x7c   : > { %s803_s26 = scalar_lea.hbm %s1401_s5, 4096  ;;  %s807_s11 = scalar_lea.hbm %s1535_s2, 8192 }
  0x7d   : > { %p804_p3 = scmp.ne.s32.totalorder %s1401_s5, %s803_s26  ;;  %p808_p2 = scmp.lt.u32.totalorder %s1401_s5, %s1535_s2 }
  0x7e   : > { %p809_p4 = scmp.lt.u32.totalorder %s807_s11, %s803_s26  ;;  %p811_p13 = scmp.lt.u32.totalorder %s803_s26, %s1401_s5 }
  0x7f   : > { %p805_p8 = pnand %p804_p3, %p1546_p1 }
  0x80   : > { %p810_p6 = por %p809_p4, %p808_p2 }
  0x81   : > { %p806_p0 = pneg %p805_p8 }
  0x82   : > { %p812_p12 = por %p811_p13, %p810_p6 }
  0x84   : > { %p813_p10 = pnand %p812_p12, %p806_p0 }
  0x86   : > { %816 = shalt.err (!%p813_p10)
}
  0x87   : > { %s898_s28 = smov 256   ;;  %s899_s19 = smov 16   ;;  %468 = vst [vmem:[%s1135_s10 + $0xf0] sm:$0xff] %v436_v30  ;;  %469 = vst [vmem:[%s1135_s10 + $0xf8] sm:$0xff] %v437_v31 }
  0x88   : > { %673 = dma.vmem_to_hbm [thread:$0]  (%p1546_p1), %s1414_s20, 4096, %s1401_s5, %s471_s8, %s898_s28, %s898_s28, %s899_s19  }
  0x89   : > { %s476_s30 = scalar_lea.sflag [#allocation9], %s1081_s6  ;;  %s817_s7 = scalar_lea.vmem %s1453_s17, 4096 }
  0x8a   : > { %p818_p5 = scmp.ne.s32.totalorder %s1453_s17, %s817_s7  ;;  %s900_s16 = smov [#allocation8]  }
  0x8b   : > { %s821_s27 = sshll.u32 %s900_s16, 4  ;;  %s822_s27 = int_to_ptr.vmem [resolvable:$false] %s821_s27 }
  0x8c   : > { %p819_p7 = pnand %p818_p5, %p1546_p1  ;;  %s823_s26 = scalar_lea.vmem %s822_s27, 8192 }
  0x8d   : > { %p824_p11 = scmp.lt.s32.totalorder %s1453_s17, %s822_s27  ;;  %p825_p3 = scmp.lt.s32.totalorder %s823_s26, %s817_s7 }
  0x8e   : > { %p820_p9 = pneg %p819_p7 }
  0x8f   : > { %p826_p8 = por %p825_p3, %p824_p11 }
  0x91   : > { %p827_p0 = pnand %p826_p8, %p820_p9 }
  0x93   : > { %830 = shalt.err (!%p827_p0)
}
  0x94   : > { %s831_s10 = scalar_lea.hbm %s1451_s22, 4096  ;;  %s835_s8 = scalar_lea.hbm %s1536_s3, 8192 }
  0x95   : > { %p832_p2 = scmp.ne.s32.totalorder %s1451_s22, %s831_s10  ;;  %p836_p13 = scmp.lt.u32.totalorder %s1451_s22, %s1536_s3 }
  0x96   : > { %p837_p12 = scmp.lt.u32.totalorder %s835_s8, %s831_s10  ;;  %p839_p5 = scmp.lt.u32.totalorder %s831_s10, %s1451_s22 }
  0x97   : > { %p833_p4 = pnand %p832_p2, %p1546_p1 }
  0x98   : > { %p838_p10 = por %p837_p12, %p836_p13 }
  0x99   : > { %p834_p6 = pneg %p833_p4 }
  0x9a   : > { %p840_p7 = por %p839_p5, %p838_p10 }
  0x9c   : > { %p841_p9 = pnand %p840_p7, %p834_p6 }
  0x9e   : > { %844 = shalt.err (!%p841_p9)
}
  0x9f   : > { %674 = dma.vmem_to_hbm [thread:$0]  (%p1546_p1), %s1453_s17, 4096, %s1451_s22, %s476_s30, %s898_s28, %s898_s28, %s899_s19  }
  0xa0 PF: > { %s522_s11 = sand.u32 1, %s879_s12   ;;  %p1547_p11 = scmp.ne.s32.totalorder %s1542_s25, 0 }
  0xa1   : > { %p1548_p3 = scmp.ge.s32.totalorder %s891_s15, 2  ;;  %s523_s29 = scalar_lea.sflag [#allocation4], %s522_s11 }
  0xa3   : > { %p685_p8 = pnand %p1548_p3, %p1547_p11 }
  0xa5   : > { %870 = dma.done.wait (!%p685_p8), %s523_s29, 4096  }
  0xa6   : > { %872 = vsyncadd (!%p685_p8), %s523_s29, 4294963200  ;;  %s532_s24 = scalar_lea.sflag [#allocation9], %s522_s11 }
  0xa7   : > { %874 = dma.done.wait (!%p685_p8), %s532_s24, 4096  }
  0xa8   : > { %876 = vsyncadd (!%p685_p8), %s532_s24, 4294963200  ;;  %p23_p1 = scmp.ge.s32.totalorder %s946_s18, 4   ;;  %s1549_s12 = smov %s883_s13 }
  0xa9   : > { %s1550_s13 = smov %s887_s14  ;;  %s1551_s14 = smov %s958_s21 }
  0xaa   : > { %s1552_s15 = smov %s946_s18  ;;  %25 = sbr.rel (!%p23_p1) target bundleno = 9 (0x9), region = 103 }
  0xb1   :  { %537 = vsyncpa [#allocation3], 1 }
  0xb2   :  { %539 = vsyncpa [#allocation3 + $0x1], 1 }
  0xb3   :  { %540 = vsyncpa [#allocation6], 1 }
  0xb4   :  { %542 = vsyncpa [#allocation6 + $0x1], 1 }
  0xb5   :  { %543 = vsyncpa [#allocation4], 1 }
  0xb6   :  { %545 = vsyncpa [#allocation4 + $0x1], 1 }
  0xb7   :  { %546 = vsyncpa [#allocation9], 1 }
  0xb8   :  { %548 = vsyncpa [#allocation9 + $0x1], 1 }

</bundles_post_ra>
